<compile_context>
chip_gen: v5e
topology: v5e:2x2
jax: 0.10.0
libtpu: 0.0.40
codegen_flags: <defaults>
</compile_context>

<pallas_src>
import functools

import jax
import jax.numpy as jnp
from jax import lax
from jax.experimental import pallas as pl
from jax.experimental.pallas import tpu as pltpu


def _conv_gemm_kernel(p_ref, w_ref, b_ref, o_ref, *, activation):
    """One grid step = one (image, spatial tile).

    p_ref : (KKC, T_HW)   im2col patches, bf16   (KKC = KH*KW*Cin)
    w_ref : (Cout, KKC)   flattened weights, bf16
    b_ref : (Cout, 1)     bias, f32
    o_ref : (Cout, T_HW)  output tile; spatial dim on lanes (lane-dense store)
    """
    # Single MXU contraction, f32 accumulation; bias fused into the epilogue
    # (no separate zero-init pass, bias broadcast happens once per tile).
    acc = jnp.dot(w_ref[...], p_ref[...], preferred_element_type=jnp.float32)
    acc = acc + b_ref[...]                 # (Cout, 1) broadcasts over lanes
    if activation is not None:
        acc = activation(acc)              # epilogue math stays in f32 (v5e VPU has no bf16)
    o_ref[...] = acc.astype(o_ref.dtype)


def _pick_spatial_tile(hw):
    """Largest multiple-of-128 tile dividing hw (capped), preferring >=2 tiles."""
    if hw % 128 != 0:
        return hw                          # full-extent block (legal, masked)
    cap = min(hw, 1024)
    tile = 128
    for cand in range(cap, 0, -128):
        if hw % cand == 0:
            tile = cand
            break
    if tile == hw and hw > 128:            # split so the grid has >1 spatial step
        for cand in range(hw // 2, 127, -128):
            if hw % cand == 0 and cand % 128 == 0:
                return cand
        return 128
    return tile


def conv2d_pallas(x_nchw, weight_oihw, bias, *, stride=1, padding=0,
                  dilation=1, activation=None):
    """PyTorch Conv2d module forward: conv + bias + optional activation."""
    n, cin, h, w = x_nchw.shape
    cout, cin_w, kh, kw = weight_oihw.shape
    assert cin == cin_w

    h_out = (h + 2 * padding - dilation * (kh - 1) - 1) // stride + 1
    w_out = (w + 2 * padding - dilation * (kw - 1) - 1) // stride + 1
    hw = h_out * w_out
    kkc = kh * kw * cin

    # ---- wrapper glue: layout plumbing only (pad, im2col, flatten, cast) ----
    xb = x_nchw.astype(jnp.bfloat16)
    xp = jnp.pad(xb, ((0, 0), (0, 0), (padding, padding), (padding, padding)))
    taps = []
    for i in range(kh):
        for j in range(kw):
            h0, w0 = i * dilation, j * dilation
            taps.append(xp[:, :,
                           h0: h0 + (h_out - 1) * stride + 1: stride,
                           w0: w0 + (w_out - 1) * stride + 1: stride])
    # (N, Cin, KH*KW, H_out, W_out) -> (N, Cin*KH*KW, HW); row = c*KH*KW + i*KW + j
    patches = jnp.stack(taps, axis=2).reshape(n, kkc, hw)               # bf16
    w_flat = weight_oihw.reshape(cout, kkc).astype(jnp.bfloat16)        # col = c*KH*KW + i*KW + j
    if bias is None:
        b2 = jnp.zeros((cout, 1), jnp.float32)
    else:
        b2 = bias.reshape(cout, 1).astype(jnp.float32)

    t_hw = _pick_spatial_tile(hw)
    grid = (n, hw // t_hw)

    kernel = functools.partial(_conv_gemm_kernel, activation=activation)

    out = pl.pallas_call(
        kernel,
        out_shape=jax.ShapeDtypeStruct((n, cout, hw), x_nchw.dtype),
        grid_spec=pltpu.PrefetchScalarGridSpec(
            num_scalar_prefetch=0,
            grid=grid,
            in_specs=[
                pl.BlockSpec((None, kkc, t_hw), lambda b, t: (b, 0, t)),
                pl.BlockSpec((cout, kkc), lambda b, t: (0, 0)),
                pl.BlockSpec((cout, 1), lambda b, t: (0, 0)),
            ],
            out_specs=pl.BlockSpec((None, cout, t_hw), lambda b, t: (b, 0, t)),
        ),
        compiler_params=pltpu.CompilerParams(
            dimension_semantics=("parallel", "parallel")),
    )(patches, w_flat, b2)

    # (N, Cout, H_out*W_out) -> NCHW: free metadata reshape, no transpose.
    return out.reshape(n, cout, h_out, w_out)


if __name__ == "__main__":
    key = jax.random.PRNGKey(0)
    kx, kw_, kb = jax.random.split(key, 3)

    # Module config: Conv2d(input_channels=4, output_channels=8, kernel_size=3,
    #                       stride=1, padding=1, dilation=1, activation=relu)
    N, CIN, H, W = 2, 4, 16, 16
    COUT, K, STRIDE, PAD, DIL = 8, 3, 1, 1, 1

    x = jax.random.normal(kx, (N, CIN, H, W), dtype=jnp.float32)

    # Deterministic init mimicking nn.Conv2d's uniform(-1/sqrt(fan_in), +)
    fan_in = CIN * K * K
    bound = 1.0 / (fan_in ** 0.5)
    weight = jax.random.uniform(kw_, (COUT, CIN, K, K), jnp.float32,
                                minval=-bound, maxval=bound)
    bias = jax.random.uniform(kb, (COUT,), jnp.float32,
                              minval=-bound, maxval=bound)

    out = conv2d_pallas(x, weight, bias, stride=STRIDE, padding=PAD,
                        dilation=DIL, activation=jax.nn.relu)
    out = jax.block_until_ready(out)

    # Reference: same bf16-rounded operands, f32 math (matches the kernel's
    # bf16-operand / f32-accumulate MXU path up to summation order).
    xq = x.astype(jnp.bfloat16).astype(jnp.float32)
    wq = weight.astype(jnp.bfloat16).astype(jnp.float32)
    ref = lax.conv_general_dilated(
        xq, wq, window_strides=(STRIDE, STRIDE),
        padding=[(PAD, PAD), (PAD, PAD)],
        rhs_dilation=(DIL, DIL),
        dimension_numbers=("NCHW", "OIHW", "NCHW"),
        precision=lax.Precision.HIGHEST)
    ref = jax.nn.relu(ref + bias.reshape(1, COUT, 1, 1))

    assert out.shape == (N, COUT, H, W)
    assert jnp.max(jnp.abs(out - ref)) < 1e-4

    print("KERNEL_OK")
</pallas_src>

<mosaic_0001>
module attributes {stable_mosaic.version = 11 : i64} {
  func.func @_conv_gemm_kernel(%arg0: i32, %arg1: i32, %arg2: memref<1x36x128xbf16, #tpu.memory_space<vmem>>, %arg3: memref<8x36xbf16, #tpu.memory_space<vmem>>, %arg4: memref<8x1xf32, #tpu.memory_space<vmem>>, %arg5: memref<1x8x128xf32, #tpu.memory_space<vmem>>) attributes {dimension_semantics = [#tpu.dimension_semantics<parallel>, #tpu.dimension_semantics<parallel>], iteration_bounds = array<i64: 2, 2>, scalar_prefetch = 0 : i64, scratch_operands = 0 : i64, tpu.core_type = #tpu.core_type<tc>, window_params = [{transform_indices = @transform_0, window_bounds = array<i64: 1, 36, 128>}, {pipeline_mode = #tpu.pipeline_mode<synchronous>, transform_indices = @transform_1, window_bounds = array<i64: 8, 36>}, {pipeline_mode = #tpu.pipeline_mode<synchronous>, transform_indices = @transform_2, window_bounds = array<i64: 8, 1>}, {transform_indices = @transform_3, window_bounds = array<i64: 1, 8, 128>}]} {
    %c0 = arith.constant 0 : index
    %c0_0 = arith.constant 0 : index
    %0 = vector.load %arg3[%c0, %c0_0] : memref<8x36xbf16, #tpu.memory_space<vmem>>, vector<8x36xbf16>
    %c0_1 = arith.constant 0 : index
    %c0_2 = arith.constant 0 : index
    %c0_3 = arith.constant 0 : index
    %1 = vector.load %arg2[%c0_1, %c0_2, %c0_3] : memref<1x36x128xbf16, #tpu.memory_space<vmem>>, vector<1x36x128xbf16>
    %2 = vector.shape_cast %1 : vector<1x36x128xbf16> to vector<36x128xbf16>
    %cst = arith.constant dense<0.000000e+00> : vector<8x128xf32>
    %3 = tpu.matmul %0, %2, %cst {dimension_numbers = #tpu.dot_dimension_numbers<[1], [0], [0], [1], [0, 0, 1, 1], [], []>} : vector<8x36xbf16>, vector<36x128xbf16>, vector<8x128xf32> -> vector<8x128xf32>
    %c0_4 = arith.constant 0 : index
    %c0_5 = arith.constant 0 : index
    %4 = vector.load %arg4[%c0_4, %c0_5] : memref<8x1xf32, #tpu.memory_space<vmem>>, vector<8x1xf32>
    %5 = vector.broadcast %4 : vector<8x1xf32> to vector<8x128xf32>
    %6 = arith.addf %3, %5 : vector<8x128xf32>
    %cst_6 = arith.constant 0.000000e+00 : f32
    %7 = vector.broadcast %cst_6 : f32 to vector<8x128xf32>
    %8 = arith.maximumf %6, %7 : vector<8x128xf32>
    %c0_7 = arith.constant 0 : index
    %c0_8 = arith.constant 0 : index
    %c0_9 = arith.constant 0 : index
    %9 = vector.load %arg5[%c0_7, %c0_8, %c0_9] : memref<1x8x128xf32, #tpu.memory_space<vmem>>, vector<1x8x128xf32>
    %10 = vector.shape_cast %9 : vector<1x8x128xf32> to vector<8x128xf32>
    %11 = vector.shape_cast %8 : vector<8x128xf32> to vector<1x8x128xf32>
    tpu.vector_store %arg5[%c0_7, %c0_8, %c0_9], %11 {strides = array<i32>} : memref<1x8x128xf32, #tpu.memory_space<vmem>>, vector<1x8x128xf32>,
    return
  }
  func.func @transform_0(%arg0: i32, %arg1: i32) -> (i32, i32, i32) {
    %c0_i32 = arith.constant 0 : i32
    %c0_i32_0 = arith.constant 0 : i32
    return %arg0, %c0_i32, %arg1 : i32, i32, i32
  }
  func.func @transform_1(%arg0: i32, %arg1: i32) -> (i32, i32) {
    %c0_i32 = arith.constant 0 : i32
    %c0_i32_0 = arith.constant 0 : i32
    %c0_i32_1 = arith.constant 0 : i32
    return %c0_i32, %c0_i32_0 : i32, i32
  }
  func.func @transform_2(%arg0: i32, %arg1: i32) -> (i32, i32) {
    %c0_i32 = arith.constant 0 : i32
    %c0_i32_0 = arith.constant 0 : i32
    %c0_i32_1 = arith.constant 0 : i32
    return %c0_i32, %c0_i32_0 : i32, i32
  }
  func.func @transform_3(%arg0: i32, %arg1: i32) -> (i32, i32, i32) {
    %c0_i32 = arith.constant 0 : i32
    %c0_i32_0 = arith.constant 0 : i32
    return %arg0, %c0_i32, %arg1 : i32, i32, i32
  }
}

</mosaic_0001>

<bundles_post_ra>
// kernel: tpu_custom_call.1
= control target key start
LH: loop header
LB: loop body
LE: loop exit
PB: predicated region body
PF: predicated region fallthrough
CT: control target
= control target key end

     0   :  { %8 = vsyncpa [#allocation4], 0  ;;  %s751_s0 = inlined_call_operand.vmem [shape: bf16[2,36,256], index: 0, kind: input, shape index: {}]   ;;  %s752_s1 = inlined_call_operand.vmem [shape: bf16[8,36], index: 1, kind: input, shape index: {}]   ;;  %s753_s2 = inlined_call_operand.vmem [shape: f32[8,1], index: 2, kind: input, shape index: {}]   ;;  %s754_s3 = inlined_call_operand.hbm [shape: f32[2,8,256], index: 3, kind: output, shape index: {}]  }
   0x1   :  { %10 = vsyncpa [#allocation4 + $0x1], 0  ;;  %s611_s12 = smov 0   ;;  %s613_s13 = smov 0  }
   0x2   :  { %s615_s14 = smov 0   ;;  %s617_s15 = smov 0  }
   0x3   :  { %s619_s16 = smov 0   ;;  %s621_s17 = smov 0  }
   0x4   :  { %s623_s18 = smov 0   ;;  %s625_s19 = smov 0  }
   0x5 LB: > { %s395_s20 = sadd.s32 4294967295, %s588_s19   ;;  %s396_s21 = sadd.s32 4294967294, %s588_s19   ;;  %s588_s19 = sphi %s625_s19, %s16_s19   ;;  %s584_s18 = sphi %s623_s18, %s764_s18   ;;  %s580_s17 = sphi %s621_s17, %s763_s17   ;;  %s576_s16 = sphi %s619_s16, %s762_s16   ;;  %s572_s15 = sphi %s617_s15, %s761_s15   ;;  %s568_s14 = sphi %s615_s14, %s760_s14   ;;  %s564_s13 = sphi %s613_s13, %s759_s13   ;;  %s560_s12 = sphi %s611_s12, %s758_s12  }
   0x6   : > { %s25_s22 = sadd.s32 1, %s580_s17  ;;  %s28_s23 = sadd.s32 1, %s584_s18 }
   0x7   : > { %p26_p0 = scmp.ge.s32.totalorder %s25_s22, 2  ;;  %p44_p1 = scmp.ne.s32.totalorder %s568_s14, %s564_s13 }
   0x8   : > { %p45_p2 = scmp.eq.s32.totalorder %s588_s19, 0  ;;  %p118_p5 = scmp.eq.s32.totalorder %s395_s20, 3 }
   0x9   : > { %s766_s22 = smov (%p26_p0, %s25_s22), 0  ;;  %s768_s23 = smov (!%p26_p0, %s28_s23), %s584_s18 }
   0xa   : > { %s33_s24 = ssub.s32 %s580_s17, %s766_s22  ;;  %p663_p3 = por %p45_p2, %p44_p1 }
   0xb   : > { %p30_p4 = scmp.ge.s32.totalorder %s768_s23, 2  ;;  %p123_p6 = scmp.ne.s32.totalorder %s564_s13, %s560_s12 }
   0xc   : > { %p124_p7 = scmp.eq.s32.totalorder %s396_s21, 3  ;;  %p671_p8 = por %p118_p5, %p44_p1 }
   0xd   : > { %s770_s23 = smov (%p30_p4, %s768_s23), 0  ;;  %s37_s30 = sadd.s32 1, %s568_s14 }
   0xe   : > { %p675_p9 = por %p124_p7, %p123_p6  ;;  %s32_s28 = ssub.s32 %s584_s18, %s770_s23 }
   0xf   : > { %s34_s29 = sor.u32 %s33_s24, %s32_s28  ;;  %p398_p11 = scmp.ge.s32.totalorder %s588_s19, 4 }
  0x10   : > { %p35_p10 = scmp.eq.s32.totalorder %s34_s29, 0 }
  0x11   : > { %146 = sbr.rel (%p398_p11) target bundleno = 34 (0x22), region = 24 }
  0x12   : > { %s683_s4 = scalar_select %p35_p10, %s568_s14, %s37_s30  }
  0x16   : > { %149 = sbr.rel (!%p663_p3) target bundleno = 34 (0x22), region = 28  ;;  %s151_s5 = sand.u32 (%p663_p3), 1, %s568_s14  }
  0x17   : > { %s419_s6 = smul.u32 (%p663_p3), 10, %s584_s18 }
  0x18   : > { %s418_s7 = smul.u32 (%p663_p3), 20, %s151_s5 }
  0x19   : > { %s155_s8 = sadd.s32 (%p663_p3), %s580_s17, %s419_s6 }
  0x1a   : > { %s399_s9 = sshll.u32 (%p663_p3), %s155_s8, 2  ;;  %s153_s21 = scalar_lea.vmem (%p663_p3), [#allocation2], %s418_s7 }
  0x1b   : > { %s157_s20 = scalar_lea.vmem %s751_s0, %s399_s9 }
  0x1c   : > { %v174_v0 = vld [vmem:[%s157_s20] sm:$0xf]  ;;  %v176_v1 = vld [vmem:[%s157_s20 + $0x8] sm:$0xf]  ;;  %v178_v2 = vld [vmem:[%s157_s20 + $0x10] sm:$0xf] }
  0x1d   : > { %175 = vst [vmem:[%s153_s21] sm:$0xf] %v174_v0  ;;  %v180_v3 = vld [vmem:[%s157_s20 + $0x18] sm:$0xf]  ;;  %v182_v4 = vld [vmem:[%s157_s20 + $0x20] sm:$0xf] }
  0x1e   : > { %177 = vst [vmem:[%s153_s21 + $0x4] sm:$0xf] %v176_v1 }
  0x1f   : > { %179 = vst [vmem:[%s153_s21 + $0x8] sm:$0xf] %v178_v2 }
  0x20   : > { %181 = vst [vmem:[%s153_s21 + $0xc] sm:$0xf] %v180_v3 }
  0x21   : > { %183 = vst [vmem:[%s153_s21 + $0x10] sm:$0xf] %v182_v4 }
  0x22 PF: > { %p400_p12 = scmp.ge.s32.totalorder %s588_s19, 1  ;;  %p216_p13 = scmp.lt.s32.totalorder %s588_s19, 5 }
  0x24   : > { %p217_p0 = pnand %p400_p12, %p216_p13 }
  0x25   : > { %s697_s24 = sand.u32 (!%p217_p0), 1, %s564_s13   ;;  %s412_s7 = sshll.u32 (!%p217_p0), %s576_s16, 1 }
  0x26   : > { %220 = sbr.rel (%p217_p0) target bundleno = 195 (0xc3), region = 69  ;;  %s308_s8 = sadd.s32 (!%p217_p0), %s572_s15, %s412_s7 }
  0x27   : > { %s420_s25 = smul.u32 (!%p217_p0), 20, %s697_s24  ;;  %s401_s9 = sshll.u32 (!%p217_p0), %s697_s24, 3 }
  0x28   : > { %s413_s10 = sshll.u32 (!%p217_p0), %s308_s8, 3  ;;  %s514_s7 = scalar_lea.hbm (!%p217_p0), %s754_s3, 32 }
  0x29   : > { %s225_s30 = scalar_lea.vmem (!%p217_p0), [#allocation2], %s420_s25  ;;  %s310_s21 = scalar_lea.hbm (!%p217_p0), %s754_s3, %s413_s10 }
  0x2a   : > { %s245_s25 = scalar_lea.vmem (!%p217_p0), [#allocation3], %s401_s9  ;;  %s314_s29 = sshll.u32 (!%p217_p0), %s310_s21, 4  ;;  %s315_s29 = int_to_ptr.hbm [resolvable:$true] %s314_s29 }
  0x2b   : > { %v590_v5 = vmov 0   ;;  %v253_v6 = vld [vmem:[%s753_s2] sm:$0xff]  ;;  %vm278_vm0 = vcmask 1041408   ;;  %vm274_vm1 = vcmask 293888   ;;  %s312_s28 = sshll.u32 %s245_s25, 4  ;;  %s508_s16 = sshra.s32 %s315_s29, 4  ;;  %s313_s28 = int_to_ptr.vmem [resolvable:$true] %s312_s28  ;;  %s509_s16 = int_to_ptr.hbm [resolvable:$true] %s508_s16 }
  0x2c   : > { %493 = vset.pattern.permute.xlu0 %v590_v5  ;;  %v252_v7 = vld [vmem:[%s225_s30 + $0x10] sm:$0x3]  ;;  %v417_v11 = vld [vmem:[%s225_s30 + $0x8] sm:$0xff]  ;;  %v416_v12 = vld [vmem:[%s225_s30] sm:$0xff]  ;;  %s298_s30 = scalar_lea.sflag [#allocation4], %s697_s24  ;;  %s510_s15 = scalar_lea.hbm %s509_s16, 8 }
  0x2d   : > { %256 = vperm.xlu0 %493, %v253_v6   ;;  %v268_v8 = vunpack.c.l.b16 %v252_v7  ;;  %v247_v13 = vld [vmem:[%s752_s1] sm:$0xf]  ;;  %p511_p1 = scmp.ne.s32.totalorder %s509_s16, %s510_s15  ;;  %p515_p4 = scmp.lt.s32.totalorder %s509_s16, %s754_s3 }
  0x2e   : > { %p516_p5 = scmp.lt.s32.totalorder %s514_s7, %s510_s15 }
  0x2f   : > { %v271_v9 = vpack.c.b16 %v268_v8, %v268_v8  ;;  %p512_p2 = pnand %p511_p1, %p671_p8 }
  0x30   : > { %p517_p6 = por %p516_p5, %p515_p4 }
  0x31   : > { %v280_v10 = vsel %vm278_vm0, %v271_v9, 0  ;;  %p513_p3 = pneg %p512_p2 }
  0x32   : > { %287 = vmatpush.bf16.msra.mxu0 %v280_v10 }
  0x33   : > { %p518_p7 = pnand %p517_p6, %p513_p3 }
  0x36   : > { %288 = vmatpush.bf16.msra.mxu0 %v417_v11 }
  0x3a   : > { %289 = vmatpush.bf16.msra.mxu0 %v416_v12 }
  0x3d   : > { %410 = vmatmul.msk.bf16.vlgmr.msra.gmra.mxu0 %vm274_vm1, %v247_v13 }
  0x9f   : > { %v257_v14 = vpop.permute.xlu0 %256 }
  0xba   : > { %v291_v15 = vpop.f32.mrf.mxu0 }
  0xbb   : > { %v292_v16 = vadd.f32 %v291_v15, %v257_v14 }
  0xbd   : > { %v295_v17 = vmax.f32 %v292_v16, 0.0 }
  0xbf   : > { %296 = vst [vmem:[%s245_s25] sm:$0xff] %v295_v17 }
  0xc0   : > { %521 = shalt.err (!%p518_p7)
}
  0xc1   : > { %421 = dma.vmem_to_hbm [thread:$0]  (%p671_p8), %s313_s28, 128, %s315_s29, %s298_s30  }
  0xc2   : > { %v293_v18 = vpop.f32.mrf.mxu0 }
  0xc3 PF: > { %p427_p10 = scmp.ge.s32.totalorder %s588_s19, 2  ;;  %s326_s24 = sand.u32 1, %s560_s12  }
  0xc4   : > { %s327_s10 = scalar_lea.sflag [#allocation4], %s326_s24 }
  0xc5   : > { %p424_p11 = pnand %p427_p10, %p675_p9 }
  0xc7   : > { %p425_p12 = pneg %p424_p11 }
  0xc9   : > { %555 = dma.done.wait (%p425_p12), %s327_s10, 128  }
  0xca   : > { %557 = vsyncadd (%p425_p12), %s327_s10, 4294967168  ;;  %s16_s19 = sadd.s32 1, %s588_s19   ;;  %s758_s12 = smov %s564_s13 }
  0xcb   : > { %p13_p13 = scmp.ge.s32.totalorder %s16_s19, 6   ;;  %s759_s13 = smov %s568_s14 }
  0xcc   : > { %s760_s14 = smov %s683_s4  ;;  %s761_s15 = smov %s580_s17 }
  0xcd   : > { %s762_s16 = smov %s584_s18  ;;  %s763_s17 = smov %s766_s22 }
  0xce   : > { %s764_s18 = smov %s770_s23  ;;  %15 = sbr.rel (!%p13_p13) target bundleno = 5 (0x5), region = 113 }
  0xd3   :  { %333 = vsyncpa [#allocation4], 1 }
  0xd4   :  { %335 = vsyncpa [#allocation4 + $0x1], 1 }

</bundles_post_ra>
